<compile_context>
chip_gen: v5e
topology: v5e:2x2
jax: 0.10.0
libtpu: 0.0.40
codegen_flags: <defaults>
</compile_context>

<pallas_src>
import math

import numpy as np

import jax
import jax.numpy as jnp
from jax.experimental import pallas as pl
from jax.experimental.pallas import tpu as pltpu


def _round_up(x, m):
    return ((x + m - 1) // m) * m


# =============================================================================
# One-time parameter preprocessing (host side, float64).  NOT in the hot path.
# =============================================================================
def fold_timemb_params(params, *, use_hour_index=True, use_day_index=True):
    """Folds  rfft -> per-frequency complex filter -> irfft -> Linear(L->D)  into a
    single (D, L) matrix W1M and an embedding-correction matrix CM (D, F):

        W1 @ irfft(filter(rfft(xn) - E) + E) + b1 == W1M @ xn + (CM @ E + b1)

    so the kernel only ever does dense lane-parallel matmuls."""
    w1 = np.asarray(params["w1"], dtype=np.float64)                    # (D, L)
    D, L = w1.shape
    F = L // 2 + 1

    n = np.arange(L, dtype=np.float64)
    k = np.arange(F, dtype=np.float64)
    ang = 2.0 * np.pi * np.outer(k, n) / L                             # (F, L)
    scale = 1.0 / math.sqrt(L)
    rfr = np.cos(ang) * scale                                          # Re of ortho rfft
    rfi = -np.sin(ang) * scale                                         # Im of ortho rfft
    c = np.full(F, 2.0)                                                # Hermitian doubling
    c[0] = 1.0
    if L % 2 == 0:
        c[-1] = 1.0
    ir = (rfr * c[:, None]).T                                          # (L, F) irfft from Re
    ii = (rfi * c[:, None]).T                                          # (L, F) irfft from Im

    wvec = np.asarray(params["w"], dtype=np.float64)[0]                # (L,) learned filter
    wr = rfr @ wvec                                                    # (F,) Re rfft(w)
    wi = rfi @ wvec                                                    # (F,) Im rfft(w)

    # Full linear spectral operator on the time axis, then fold into Linear1.
    M = ((ir * wr) @ rfr - (ir * wi) @ rfi
         + (ii * wi) @ rfr + (ii * wr) @ rfi)                          # (L, L)
    cm = w1 @ (ir * (1.0 - wr) - ii * wi)                              # (D, F) emb correction

    return dict(
        w1m=jnp.asarray(w1 @ M, dtype=jnp.float32),                    # (D, L)
        cm=jnp.asarray(cm, dtype=jnp.float32),                         # (D, F)
        b1=jnp.asarray(params["b1"], dtype=jnp.float32),               # (D,)
        w2=jnp.asarray(params["w2"], dtype=jnp.float32),               # (P, D)
        b2=jnp.asarray(params["b2"], dtype=jnp.float32),               # (P,)
        emb_hour=jnp.asarray(params["emb_hour"], jnp.float32) if use_hour_index else None,
        emb_day=jnp.asarray(params["emb_day"], jnp.float32) if use_day_index else None,
    )


# =============================================================================
# Kernel body (shared by both layouts; flags are compile-time constants).
# =============================================================================
def _make_kernel(L, use_revin, compute_dtype):
    inv_l = 1.0 / L
    inv_lm1 = 1.0 / max(L - 1, 1)   # L==1 guard (torch unbiased var would be inf)

    def kernel(x_ref, ce_ref, w1m_ref, w2_ref, b2_ref, o_ref):
        x = x_ref[...].astype(jnp.float32)                              # (L, TN)

        if use_revin:
            # Single-pass stats: one VALU pass for x*x, reductions on the XLU,
            # x - mean computed exactly once.
            s1 = jnp.sum(x, axis=0, keepdims=True)                      # (1, TN)
            s2 = jnp.sum(x * x, axis=0, keepdims=True)                  # (1, TN)
            mean = s1 * inv_l
            var = (s2 - s1 * mean) * inv_lm1 + 1e-5                     # unbiased, torch eps
            inv_std = jax.lax.rsqrt(var)                                # EUP slot, ~free
            xn = (x - mean) * inv_std
        else:
            xn = x

        xn_c = xn.astype(compute_dtype)
        # Folded rfft/filter/irfft/Linear1: one (D,L)@(L,TN) matmul; ce = CM@E + b1.
        a1 = (jnp.dot(w1m_ref[...], xn_c, preferred_element_type=jnp.float32)
              + ce_ref[...].astype(jnp.float32))                        # (D, TN) f32
        h = jnp.maximum(a1, 0.0).astype(compute_dtype)
        out = (jnp.dot(w2_ref[...], h, preferred_element_type=jnp.float32)
               + b2_ref[...])                                           # (P, TN) f32

        if use_revin:
            # std = var * rsqrt(var) = sqrt(var): no extra sqrt.
            out = out * (var * inv_std) + mean

        o_ref[...] = out.astype(o_ref.dtype)

    return kernel


# =============================================================================
# Hot-path forward.
# =============================================================================
def timemb_forward(x, hour_index, day_index, folded, *,
                   use_revin=True, compute_dtype=jnp.float32, io_dtype=None,
                   lane_tile=512, layout="auto"):
    """x: (B, seq_len, enc_in) -> (B, pred_len, enc_in).

    `folded` comes from fold_timemb_params (one-time prep).  compute_dtype=bf16 uses
    bf16 MXU operands with f32 accumulation; io_dtype=bf16 additionally streams x / ce
    through HBM as bf16 (pays off when the cast fuses into the producer upstream)."""
    B, L, C = x.shape
    w1m, cm, b1, w2, b2 = (folded["w1m"], folded["cm"], folded["b1"],
                           folded["w2"], folded["b2"])
    P, D = w2.shape
    hp = jax.lax.Precision.HIGHEST

    if io_dtype is None:
        io_dtype = jnp.float32 if compute_dtype == jnp.float32 else compute_dtype

    # ---- per-call embedding gather, folded through CM (tiny XLA matmul glue) ----
    E = None
    if folded["emb_hour"] is not None:
        eh = folded["emb_hour"][hour_index % folded["emb_hour"].shape[0]]   # (B, C, F)
        E = eh if E is None else E + eh
    if folded["emb_day"] is not None:
        ed = folded["emb_day"][day_index % folded["emb_day"].shape[0]]
        E = ed if E is None else E + ed
    has_emb = E is not None

    kernel = _make_kernel(L, use_revin, compute_dtype)
    lane_tile = max(128, (lane_tile // 128) * 128)
    w1m_c = w1m.astype(compute_dtype)
    w2_c = w2.astype(compute_dtype)
    b2_col = b2[:, None]                                                    # (P, 1) f32

    if layout == "auto":
        layout = "native" if C >= 128 else "fused"

    # ------------------------------------------------------------------------
    # Native path: 2-D grid (batch, C-tiles) on the unmodified (B, L, C) layout.
    # No HBM transposes on either side of the kernel.
    # ------------------------------------------------------------------------
    if layout == "native":
        if C % 128 == 0:
            TC = min(lane_tile, C)
            NC = C // TC
        else:
            TC, NC = C, 1                  # full-extent lane block (legal for any C)

        if has_emb:
            ce = (jnp.einsum("df,bcf->bdc", cm, E, precision=hp)
                  + b1[None, :, None]).astype(io_dtype)                     # (B, D, C)
            ce_spec = pl.BlockSpec((None, D, TC), lambda b, j: (b, 0, j))
        else:
            ce = b1.astype(io_dtype)[None, :, None]                         # (1, D, 1)
            ce_spec = pl.BlockSpec((None, D, 1), lambda b, j: (0, 0, 0))

        return pl.pallas_call(
            kernel,
            out_shape=jax.ShapeDtypeStruct((B, P, C), x.dtype),
            grid=(B, NC),
            in_specs=[
                pl.BlockSpec((None, L, TC), lambda b, j: (b, 0, j)),         # x slab
                ce_spec,                                                     # CM@E + b1
                pl.BlockSpec((D, L), lambda b, j: (0, 0)),                   # W1M (resident)
                pl.BlockSpec((P, D), lambda b, j: (0, 0)),                   # W2  (resident)
                pl.BlockSpec((P, 1), lambda b, j: (0, 0)),                   # b2
            ],
            out_specs=pl.BlockSpec((None, P, TC), lambda b, j: (b, 0, j)),
            compiler_params=pltpu.CompilerParams(
                dimension_semantics=("parallel", "parallel")),               # v7x: 2 TCs
        )(x.astype(io_dtype), ce, w1m_c, w2_c, b2_col)

    # ------------------------------------------------------------------------
    # Fused path (small C): lane-fuse batch & channel, column j = b*C + c.
    # Lanes always padded to a multiple of 128; >= 2 tiles whenever >= 256 lanes.
    # ------------------------------------------------------------------------
    N = B * C
    Npad = _round_up(N, 128)
    if Npad >= 256:
        TN = min(lane_tile, _round_up((Npad + 1) // 2, 128))
    else:
        TN = Npad
    Npad = _round_up(Npad, TN)
    num_tiles = Npad // TN

    x_fused = jnp.transpose(x, (1, 0, 2)).reshape(L, N)
    x_fused = jnp.pad(x_fused, ((0, 0), (0, Npad - N))).astype(io_dtype)

    if has_emb:
        ce = (jnp.einsum("df,bcf->dbc", cm, E, precision=hp).reshape(D, N)
              + b1[:, None])
        ce = jnp.pad(ce, ((0, 0), (0, Npad - N))).astype(io_dtype)           # (D, Npad)
        ce_spec = pl.BlockSpec((D, TN), lambda j: (0, j))
    else:
        ce = b1.astype(io_dtype)[:, None]                                    # (D, 1)
        ce_spec = pl.BlockSpec((D, 1), lambda j: (0, 0))

    out = pl.pallas_call(
        kernel,
        out_shape=jax.ShapeDtypeStruct((P, Npad), x.dtype),
        grid=(num_tiles,),
        in_specs=[
            pl.BlockSpec((L, TN), lambda j: (0, j)),                         # fused x
            ce_spec,                                                         # CM@E + b1
            pl.BlockSpec((D, L), lambda j: (0, 0)),
            pl.BlockSpec((P, D), lambda j: (0, 0)),
            pl.BlockSpec((P, 1), lambda j: (0, 0)),
        ],
        out_specs=pl.BlockSpec((P, TN), lambda j: (0, j)),
        compiler_params=pltpu.CompilerParams(
            dimension_semantics=("parallel",)),
    )(x_fused, ce, w1m_c, w2_c, b2_col)

    # (P, B*C) -> (B, P, C)
    return jnp.transpose(out[:, :N].reshape(P, B, C), (1, 0, 2))


# =============================================================================
# Pure-JAX mirror of the PyTorch forward (uses jnp.fft) for verification.
# =============================================================================
def timemb_reference(x, hour_index, day_index, params, *,
                     use_revin=True, use_hour_index=True, use_day_index=True):
    L = x.shape[1]
    hp = jax.lax.Precision.HIGHEST
    if use_revin:
        mean = jnp.mean(x, axis=1, keepdims=True)
        var = jnp.var(x, axis=1, keepdims=True, ddof=1) + 1e-5
        x = (x - mean) / jnp.sqrt(var)
    xt = jnp.transpose(x, (0, 2, 1))
    xf = jnp.fft.rfft(xt, axis=2, norm="ortho")
    wf = jnp.fft.rfft(params["w"], axis=1, norm="ortho")
    xr, xi = jnp.real(xf), jnp.imag(xf)
    eh = ed = None
    if use_hour_index:
        eh = params["emb_hour"][hour_index % params["emb_hour"].shape[0]]
        xr = xr - eh
    if use_day_index:
        ed = params["emb_day"][day_index % params["emb_day"].shape[0]]
        xr = xr - ed
    y = (xr + 1j * xi) * wf
    yr, yi = jnp.real(y), jnp.imag(y)
    if use_day_index:
        yr = yr + ed
    if use_hour_index:
        yr = yr + eh
    yt = jnp.fft.irfft(yr + 1j * yi, n=L, axis=2, norm="ortho")
    h = jnp.maximum(jnp.matmul(yt, params["w1"].T, precision=hp) + params["b1"], 0.0)
    out = jnp.matmul(h, params["w2"].T, precision=hp) + params["b2"]
    out = jnp.transpose(out, (0, 2, 1))
    if use_revin:
        out = out * jnp.sqrt(var) + mean
    return out


if __name__ == "__main__":
    # Small config consistent with the module: seq_len=16, pred_len=8, enc_in=4,
    # d_model=32, hour_length=24, day_length=7, use_revin/hour/day = True.
    # (For perf tuning use realistic dims L>=96, D>=128, P>=96; this is correctness only.)
    B, L, C, D, P = 2, 16, 4, 32, 8
    HOUR_LEN, DAY_LEN = 24, 7
    F = L // 2 + 1

    key = jax.random.PRNGKey(0)
    ks = jax.random.split(key, 10)
    x = jax.random.normal(ks[0], (B, L, C), dtype=jnp.float32)
    hour_index = jax.random.randint(ks[1], (B,), 0, 10_000)
    day_index = jax.random.randint(ks[2], (B,), 0, 10_000)

    # Synthetic parameters (shapes per Model.__init__); the module inits embeddings
    # with zeros — small random values are used so that path is actually exercised.
    params = dict(
        emb_hour=0.02 * jax.random.normal(ks[3], (HOUR_LEN, C, F), dtype=jnp.float32),
        emb_day=0.02 * jax.random.normal(ks[4], (DAY_LEN, C, F), dtype=jnp.float32),
        w=0.02 * jax.random.normal(ks[5], (1, L), dtype=jnp.float32),          # self.w
        w1=(1.0 / math.sqrt(L)) * jax.random.normal(ks[6], (D, L), dtype=jnp.float32),
        b1=0.01 * jax.random.normal(ks[7], (D,), dtype=jnp.float32),
        w2=(1.0 / math.sqrt(D)) * jax.random.normal(ks[8], (P, D), dtype=jnp.float32),
        b2=0.01 * jax.random.normal(ks[9], (P,), dtype=jnp.float32),
    )

    folded = fold_timemb_params(params)        # one-time prep, outside the hot path
    ref = timemb_reference(x, hour_index, day_index, params)

    # 1) f32, lane-fused (L, B*C) path (C < 128) — tight tolerance.
    out = jax.block_until_ready(timemb_forward(x, hour_index, day_index, folded))
    assert out.shape == (B, P, C), out.shape
    if not bool(jnp.allclose(out, ref, rtol=1e-3, atol=1e-3)):
        raise AssertionError(
            f"f32 fused-path mismatch, max abs err="
            f"{float(jnp.max(jnp.abs(out - ref)))}")

    # 2) f32, native (B, L, C) path (no wrapper transposes), small C=128 instance.
    C2 = 128
    x2 = jax.random.normal(ks[0], (B, L, C2), dtype=jnp.float32)
    params2 = dict(
        params,
        emb_hour=0.02 * jax.random.normal(ks[3], (HOUR_LEN, C2, F), dtype=jnp.float32),
        emb_day=0.02 * jax.random.normal(ks[4], (DAY_LEN, C2, F), dtype=jnp.float32),
    )
    folded2 = fold_timemb_params(params2)
    ref2 = timemb_reference(x2, hour_index, day_index, params2)
    out2 = jax.block_until_ready(timemb_forward(x2, hour_index, day_index, folded2))
    assert out2.shape == (B, P, C2), out2.shape
    if not bool(jnp.allclose(out2, ref2, rtol=1e-3, atol=1e-3)):
        raise AssertionError(
            f"f32 native-path mismatch, max abs err="
            f"{float(jnp.max(jnp.abs(out2 - ref2)))}")

    # 3) bf16 MXU operands + bf16 input DMA (f32 accumulation / f32 RevIN stats).
    out_bf16 = jax.block_until_ready(
        timemb_forward(x, hour_index, day_index, folded,
                       compute_dtype=jnp.bfloat16, io_dtype=jnp.bfloat16))
    if not bool(jnp.allclose(out_bf16, ref, rtol=5e-2, atol=5e-2)):
        raise AssertionError(
            f"bf16 path mismatch, max abs err="
            f"{float(jnp.max(jnp.abs(out_bf16 - ref)))}")

    print("KERNEL_OK")
</pallas_src>

<mosaic_0001>
module attributes {stable_mosaic.version = 11 : i64} {
  func.func @kernel(%arg0: i32, %arg1: memref<16x128xf32, #tpu.memory_space<vmem>>, %arg2: memref<32x128xf32, #tpu.memory_space<vmem>>, %arg3: memref<32x16xf32, #tpu.memory_space<vmem>>, %arg4: memref<8x32xf32, #tpu.memory_space<vmem>>, %arg5: memref<8x1xf32, #tpu.memory_space<vmem>>, %arg6: memref<8x128xf32, #tpu.memory_space<vmem>>) attributes {dimension_semantics = [#tpu.dimension_semantics<parallel>], iteration_bounds = array<i64: 1>, scalar_prefetch = 0 : i64, scratch_operands = 0 : i64, tpu.core_type = #tpu.core_type<tc>, window_params = [{transform_indices = @transform_0, window_bounds = array<i64: 16, 128>}, {transform_indices = @transform_1, window_bounds = array<i64: 32, 128>}, {pipeline_mode = #tpu.pipeline_mode<synchronous>, transform_indices = @transform_2, window_bounds = array<i64: 32, 16>}, {pipeline_mode = #tpu.pipeline_mode<synchronous>, transform_indices = @transform_3, window_bounds = array<i64: 8, 32>}, {pipeline_mode = #tpu.pipeline_mode<synchronous>, transform_indices = @transform_4, window_bounds = array<i64: 8, 1>}, {transform_indices = @transform_5, window_bounds = array<i64: 8, 128>}]} {
    %c0 = arith.constant 0 : index
    %c0_0 = arith.constant 0 : index
    %0 = vector.load %arg1[%c0, %c0_0] : memref<16x128xf32, #tpu.memory_space<vmem>>, vector<16x128xf32>
    %cst = arith.constant dense<0.000000e+00> : vector<128xf32>
    %1 = vector.multi_reduction <add>, %0, %cst [0] : vector<16x128xf32> to vector<128xf32>
    %2 = vector.shape_cast %1 : vector<128xf32> to vector<1x128xf32>
    %3 = arith.mulf %0, %0 : vector<16x128xf32>
    %cst_1 = arith.constant dense<0.000000e+00> : vector<128xf32>
    %4 = vector.multi_reduction <add>, %3, %cst_1 [0] : vector<16x128xf32> to vector<128xf32>
    %5 = vector.shape_cast %4 : vector<128xf32> to vector<1x128xf32>
    %cst_2 = arith.constant 6.250000e-02 : f32
    %6 = vector.broadcast %cst_2 : f32 to vector<1x128xf32>
    %7 = arith.mulf %2, %6 : vector<1x128xf32>
    %8 = arith.mulf %2, %7 : vector<1x128xf32>
    %9 = arith.subf %5, %8 : vector<1x128xf32>
    %cst_3 = arith.constant 0.0666666701 : f32
    %10 = vector.broadcast %cst_3 : f32 to vector<1x128xf32>
    %11 = arith.mulf %9, %10 : vector<1x128xf32>
    %cst_4 = arith.constant 9.99999974E-6 : f32
    %12 = vector.broadcast %cst_4 : f32 to vector<1x128xf32>
    %13 = arith.addf %11, %12 : vector<1x128xf32>
    %14 = math.rsqrt %13 : vector<1x128xf32>
    %15 = vector.broadcast %7 : vector<1x128xf32> to vector<16x128xf32>
    %16 = arith.subf %0, %15 : vector<16x128xf32>
    %17 = vector.broadcast %14 : vector<1x128xf32> to vector<16x128xf32>
    %18 = arith.mulf %16, %17 : vector<16x128xf32>
    %c0_5 = arith.constant 0 : index
    %c0_6 = arith.constant 0 : index
    %19 = vector.load %arg3[%c0_5, %c0_6] : memref<32x16xf32, #tpu.memory_space<vmem>>, vector<32x16xf32>
    %cst_7 = arith.constant dense<0.000000e+00> : vector<32x128xf32>
    %20 = tpu.matmul %19, %18, %cst_7 {dimension_numbers = #tpu.dot_dimension_numbers<[1], [0], [0], [1], [0, 0, 1, 1], [], []>} : vector<32x16xf32>, vector<16x128xf32>, vector<32x128xf32> -> vector<32x128xf32>
    %c0_8 = arith.constant 0 : index
    %c0_9 = arith.constant 0 : index
    %21 = vector.load %arg2[%c0_8, %c0_9] : memref<32x128xf32, #tpu.memory_space<vmem>>, vector<32x128xf32>
    %22 = arith.addf %20, %21 : vector<32x128xf32>
    %cst_10 = arith.constant 0.000000e+00 : f32
    %23 = vector.broadcast %cst_10 : f32 to vector<32x128xf32>
    %24 = arith.maximumf %22, %23 : vector<32x128xf32>
    %c0_11 = arith.constant 0 : index
    %c0_12 = arith.constant 0 : index
    %25 = vector.load %arg4[%c0_11, %c0_12] : memref<8x32xf32, #tpu.memory_space<vmem>>, vector<8x32xf32>
    %cst_13 = arith.constant dense<0.000000e+00> : vector<8x128xf32>
    %26 = tpu.matmul %25, %24, %cst_13 {dimension_numbers = #tpu.dot_dimension_numbers<[1], [0], [0], [1], [0, 0, 1, 1], [], []>} : vector<8x32xf32>, vector<32x128xf32>, vector<8x128xf32> -> vector<8x128xf32>
    %c0_14 = arith.constant 0 : index
    %c0_15 = arith.constant 0 : index
    %27 = vector.load %arg5[%c0_14, %c0_15] : memref<8x1xf32, #tpu.memory_space<vmem>>, vector<8x1xf32>
    %28 = vector.broadcast %27 : vector<8x1xf32> to vector<8x128xf32>
    %29 = arith.addf %26, %28 : vector<8x128xf32>
    %30 = arith.mulf %13, %14 : vector<1x128xf32>
    %31 = vector.broadcast %30 : vector<1x128xf32> to vector<8x128xf32>
    %32 = arith.mulf %29, %31 : vector<8x128xf32>
    %33 = vector.broadcast %7 : vector<1x128xf32> to vector<8x128xf32>
    %34 = arith.addf %32, %33 : vector<8x128xf32>
    %c0_16 = arith.constant 0 : index
    %c0_17 = arith.constant 0 : index
    %35 = vector.load %arg6[%c0_16, %c0_17] : memref<8x128xf32, #tpu.memory_space<vmem>>, vector<8x128xf32>
    tpu.vector_store %arg6[%c0_16, %c0_17], %34 {strides = array<i32>} : memref<8x128xf32, #tpu.memory_space<vmem>>, vector<8x128xf32>,
    return
  }
  func.func @transform_0(%arg0: i32) -> (i32, i32) {
    %c0_i32 = arith.constant 0 : i32
    %c0_i32_0 = arith.constant 0 : i32
    return %c0_i32, %arg0 : i32, i32
  }
  func.func @transform_1(%arg0: i32) -> (i32, i32) {
    %c0_i32 = arith.constant 0 : i32
    %c0_i32_0 = arith.constant 0 : i32
    return %c0_i32, %arg0 : i32, i32
  }
  func.func @transform_2(%arg0: i32) -> (i32, i32) {
    %c0_i32 = arith.constant 0 : i32
    %c0_i32_0 = arith.constant 0 : i32
    %c0_i32_1 = arith.constant 0 : i32
    return %c0_i32, %c0_i32_0 : i32, i32
  }
  func.func @transform_3(%arg0: i32) -> (i32, i32) {
    %c0_i32 = arith.constant 0 : i32
    %c0_i32_0 = arith.constant 0 : i32
    %c0_i32_1 = arith.constant 0 : i32
    return %c0_i32, %c0_i32_0 : i32, i32
  }
  func.func @transform_4(%arg0: i32) -> (i32, i32) {
    %c0_i32 = arith.constant 0 : i32
    %c0_i32_0 = arith.constant 0 : i32
    %c0_i32_1 = arith.constant 0 : i32
    return %c0_i32, %c0_i32_0 : i32, i32
  }
  func.func @transform_5(%arg0: i32) -> (i32, i32) {
    %c0_i32 = arith.constant 0 : i32
    %c0_i32_0 = arith.constant 0 : i32
    return %c0_i32, %arg0 : i32, i32
  }
}

</mosaic_0001>

<bundles_post_ra>
// kernel: tpu_custom_call.1
= control target key start
LH: loop header
LB: loop body
LE: loop exit
PB: predicated region body
PF: predicated region fallthrough
CT: control target
= control target key end

     0   :  { %s280_s0 = inlined_call_operand.vmem [shape: f32[16,128], index: 0, kind: input, shape index: {}]   ;;  %s281_s1 = inlined_call_operand.vmem [shape: f32[32,128], index: 1, kind: input, shape index: {}]   ;;  %s282_s2 = inlined_call_operand.vmem [shape: f32[32,16], index: 2, kind: input, shape index: {}]   ;;  %s283_s3 = inlined_call_operand.vmem [shape: f32[8,32], index: 3, kind: input, shape index: {}]   ;;  %s284_s4 = inlined_call_operand.vmem [shape: f32[8,1], index: 4, kind: input, shape index: {}]   ;;  %s285_s5 = inlined_call_operand.hbm [shape: f32[8,128], index: 5, kind: output, shape index: {}]  }
   0x1   :  { %v21_v0 = vld [vmem:[%s280_s0] sm:$0xff]  ;;  %v22_v1 = vld [vmem:[%s280_s0 + $0x8] sm:$0xff] }
   0x2   :  { %10 = vsyncpa [#allocation3], 0  ;;  %v23_v2 = vadd.f32 %v22_v1, %v21_v0  ;;  %v30_v3 = vmul.f32 %v21_v0, %v21_v0  ;;  %v31_v4 = vmul.f32 %v22_v1, %v22_v1  ;;  %v59_v34 = vld [vmem:[%s282_s2 + $0x8] sm:$0xff]  ;;  %vm66_vm3 = vcmask 130048   ;;  %v61_v35 = vld [vmem:[%s282_s2 + $0x18] sm:$0xff]  ;;  %s154_s17 = sshll.u32 %s285_s5, 4  ;;  %s155_s17 = int_to_ptr.hbm [resolvable:$true] %s154_s17 }
   0x3   :  { %v58_v36 = vld [vmem:[%s282_s2] sm:$0xff]  ;;  %v60_v37 = vld [vmem:[%s282_s2 + $0x10] sm:$0xff]  ;;  %v203_v39 = vmov 0   ;;  %v65_v40 = vld [vmem:[%s281_s1 + $0x18] sm:$0xff]  ;;  %vm119_vm4 = vcmask 261120  }
   0x4   :  { %v24_v5 = vrot.slane %v23_v2, 4  ;;  %v32_v6 = vadd.f32 %v31_v4, %v30_v3  ;;  %v113_v38 = vld [vmem:[%s284_s4] sm:$0xff]  ;;  %174 = vset.pattern.permute.xlu0 %v203_v39  ;;  %v63_v45 = vld [vmem:[%s281_s1 + $0x8] sm:$0xff]  ;;  %v64_v46 = vld [vmem:[%s281_s1 + $0x10] sm:$0xff] }
   0x5   :  { %116 = vperm.xlu0 %174, %v113_v38   ;;  %v62_v47 = vld [vmem:[%s281_s1] sm:$0xff]  ;;  %s204_s1 = smov [#allocation2]  }
   0x6   :  { %v25_v7 = vadd.f32 %v24_v5, %v23_v2  ;;  %v33_v8 = vrot.slane %v32_v6, 4  ;;  %v112_v56 = vld [vmem:[%s283_s3] sm:$0xff]  ;;  %s152_s14 = sshll.u32 %s204_s1, 4  ;;  %s153_s14 = int_to_ptr.vmem [resolvable:$true] %s152_s14 }
   0x8   :  { %v26_v9 = vrot.slane %v25_v7, 2  ;;  %v34_v10 = vadd.f32 %v33_v8, %v32_v6 }
   0xa   :  { %v27_v11 = vadd.f32 %v26_v9, %v25_v7  ;;  %v35_v12 = vrot.slane %v34_v10, 2 }
   0xc   :  { %v28_v13 = vrot.slane %v27_v11, 1  ;;  %v36_v14 = vadd.f32 %v35_v12, %v34_v10 }
   0xe   :  { %v29_v15 = vadd.f32 %v28_v13, %v27_v11  ;;  %v37_v16 = vrot.slane %v36_v14, 1 }
  0x10   :  { %v38_v17 = vadd.f32 %v37_v16, %v36_v14  ;;  %v241_v18 = vmul.f32 0.0625, %v29_v15 }
  0x12   :  { %v40_v19 = vmul.f32 %v241_v18, %v29_v15  ;;  %v55_v28 = vsub.f32 %v22_v1, %v241_v18  ;;  %v54_v29 = vsub.f32 %v21_v0, %v241_v18 }
  0x14   :  { %v41_v20 = vsub.f32 %v38_v17, %v40_v19 }
  0x16   :  { %v42_v21 = vmul.f32 0.06666667, %v41_v20 }
  0x18   :  { %v43_v22 = vadd.f32 1e-05, %v42_v21 }
  0x1a   :  { %175 = vrsqrt.f32 %v43_v22  ;;  %vm50_vm0 = vweird.f32 %v43_v22 }
  0x20   :  { %v176_v23 = vpop.eup %175 }
  0x21   :  { %v45_v24 = vmul.f32 %v176_v23, %v43_v22  ;;  %vm51_vm1 = vweird.f32 %v176_v23 }
  0x22   :  { %vm52_vm2 = vmor %vm50_vm0, %vm51_vm1 }
  0x23   :  { %v46_v25 = vmul.f32 %v176_v23, %v45_v24 }
  0x25   :  { %v47_v26 = vmul.f32 0.5, %v46_v25 }
  0x27   :  { %v48_v27 = vsub.f32 1.5, %v47_v26 }
  0x29   :  { %v49_v30 = vmul.f32 %v176_v23, %v48_v27 }
  0x2b   :  { %v53_v31 = vsel %vm52_vm2, %v176_v23, %v49_v30 }
  0x2c   :  { %v57_v32 = vmul.f32 %v55_v28, %v53_v31  ;;  %v56_v33 = vmul.f32 %v54_v29, %v53_v31  ;;  %v143_v58 = vmul.f32 %v53_v31, %v43_v22 }
  0x2e   :  { %168 = vmatpush.msra.mxu2 %v57_v32  ;;  %169 = vmatpush.msra.mxu3 %v57_v32 }
  0x2f   :  { %93 = vmatpush.msra.mxu0 %v57_v32 }
  0x30   :  { %170 = vmatpush.msra.mxu2 %v56_v33  ;;  %171 = vmatpush.msra.mxu3 %v56_v33 }
  0x31   :  { %164 = vmatmul.msk.f32.vlgmr.msra.gmra.mxu2 %vm66_vm3, %v59_v34  ;;  %166 = vmatmul.msk.f32.vlgmr.msra.gmra.mxu3 %vm66_vm3, %v61_v35 }
  0x32   :  { %94 = vmatpush.msra.mxu0 %v56_v33 }
  0x33   :  { %163 = vmatmul.msk.f32.vlgmr.msra.gmra.mxu0 %vm66_vm3, %v58_v36 }
  0x39   :  { %165 = vmatmul.msk.f32.gmra.mxu2 %vm66_vm3, %v60_v37 }
  0x77   :  { %v117_v57 = vpop.permute.xlu0 %116 }
  0xb0   :  { %v96_v48 = vpop.f32.mrf.mxu0 }
  0xb1   :  { %v97_v52 = vadd.f32 %v96_v48, %v62_v47 }
  0xb3   :  { %v108_v55 = vmax.f32 %v97_v52, 0.0 }
  0xb4   :  { %v99_v41 = vpop.f32.mrf.mxu2  ;;  %v105_v42 = vpop.f32.mrf.mxu3 }
  0xb5   :  { %v106_v43 = vadd.f32 %v105_v42, %v65_v40  ;;  %v100_v50 = vadd.f32 %v99_v41, %v63_v45 }
  0xb7   :  { %v111_v44 = vmax.f32 %v106_v43, 0.0  ;;  %v109_v54 = vmax.f32 %v100_v50, 0.0 }
  0xb9   :  { %135 = vmatpush.msra.mxu1 %v111_v44 }
  0xbc   :  { %v102_v49 = vpop.f32.mrf.mxu2 }
  0xbd   :  { %v103_v51 = vadd.f32 %v102_v49, %v64_v46 }
  0xbf   :  { %v110_v53 = vmax.f32 %v103_v51, 0.0 }
  0xc1   :  { %136 = vmatpush.msra.mxu1 %v110_v53 }
  0xc3   :  { %137 = vmatpush.msra.mxu1 %v109_v54 }
  0xc5   :  { %138 = vmatpush.msra.mxu1 %v108_v55 }
  0xc6   :  { %167 = vmatmul.msk.f32.vlgmr.msra.gmra.mxu1 %vm119_vm4, %v112_v56 }
 0x143   :  { %v140_v59 = vpop.f32.mrf.mxu1 }
 0x144   :  { %v141_v60 = vadd.f32 %v140_v59, %v117_v57 }
 0x146   :  { %v144_v61 = vmul.f32 %v143_v58, %v141_v60 }
 0x148   :  { %v145_v62 = vadd.f32 %v144_v61, %v241_v18 }
 0x14a   :  { %146 = vst [vmem:[#allocation2] sm:$0xff] %v145_v62 }
 0x14b   :  { %157 = dma.vmem_to_hbm [thread:$0]  %s153_s14, 128, %s155_s17, [#allocation3]  }
 0x14c   :  { %201 = dma.done.wait [#allocation3], 128  }
 0x14d   :  { %202 = vsyncadd [#allocation3], 4294967168 }
 0x14e   :  { %162 = vsyncpa [#allocation3], 1 }

</bundles_post_ra>
